<compile_context>
chip_gen: v7x
topology: tpu7x:2x2x1
jax: 0.10.0
libtpu: 0.0.40
codegen_flags: <defaults>
</compile_context>

<pallas_src>
import functools

import jax
import jax.numpy as jnp
from jax import lax
from jax.experimental import pallas as pl
from jax.experimental.pallas import tpu as pltpu


# ---------------------------------------------------------------------------
# Kernels
# ---------------------------------------------------------------------------

def _layernorm_rows_kernel(x_ref, gamma_ref, beta_ref, o_ref, *, eps, chunk):
    """Generic path (d_model on the lane axis). Stats in f32, two-pass var.

    The DMA tile (x_ref / o_ref) may be several MiB; live f32 temporaries are
    bounded by processing `chunk` rows at a time.
    """
    d = x_ref.shape[-1]
    inv_d = 1.0 / d
    gamma = gamma_ref[...]                      # (1, d), param dtype
    beta = beta_ref[...]                        # (1, d)
    n_chunks = x_ref.shape[0] // chunk

    @pl.loop(0, n_chunks)
    def _(c):
        r0 = pl.multiple_of(c * chunk, chunk)
        x = x_ref[pl.ds(r0, chunk), :].astype(jnp.float32)        # (chunk, d)
        mean = jnp.sum(x, axis=-1, keepdims=True) * inv_d
        xc = x - mean
        var = jnp.sum(xc * xc, axis=-1, keepdims=True) * inv_d    # biased var
        xhat = xc * lax.rsqrt(var + eps)
        o_ref[pl.ds(r0, chunk), :] = (
            xhat.astype(gamma.dtype) * gamma + beta).astype(o_ref.dtype)


def _layernorm_packed_kernel(x_ref, seg_ref, gamma_ref, beta_ref, o_ref, *,
                             eps, d_model, chunk):
    """Lane-dense path for d_model < 128.

    k = 128 // d_model rows are packed into one 128-lane slab.  `seg` is a
    (128, 128) block-diagonal ones matrix; dot(x, seg) produces per-group sums
    already broadcast across each group's lanes (segmented reduce on the MXU).
    """
    inv_d = 1.0 / d_model
    seg = seg_ref[...]                          # (P, P) f32 block-diag ones
    gamma = gamma_ref[...]                      # (1, P) tiled gamma
    beta = beta_ref[...]                        # (1, P) tiled beta
    n_chunks = x_ref.shape[0] // chunk

    @pl.loop(0, n_chunks)
    def _(c):
        r0 = pl.multiple_of(c * chunk, chunk)
        x = x_ref[pl.ds(r0, chunk), :].astype(jnp.float32)        # (chunk, P)
        mean = jnp.dot(x, seg, preferred_element_type=jnp.float32) * inv_d
        xc = x - mean
        var = jnp.dot(xc * xc, seg,
                      preferred_element_type=jnp.float32) * inv_d  # biased var
        xhat = xc * lax.rsqrt(var + eps)
        o_ref[pl.ds(r0, chunk), :] = (
            xhat.astype(gamma.dtype) * gamma + beta).astype(o_ref.dtype)


# ---------------------------------------------------------------------------
# Tiling / VMEM planning
# ---------------------------------------------------------------------------

def _vmem_capacity_bytes():
    try:
        info = pltpu.get_tpu_info()
        cap = getattr(info, "vmem_capacity_bytes", None)
        if cap:
            return int(cap)
    except Exception:
        pass
    return 64 * 1024 * 1024        # conservative default: v7x per-TC VMEM


def _plan_tiles(n_rows, width, itemsize,
                target_input_bytes=8 * 1024 * 1024,
                max_chunk_rows=256):
    """Pick (row_tile, chunk_rows, vmem_limit_bytes).

    row_tile sizes the HBM<->VMEM DMA tile (amortize per-step overhead);
    chunk_rows bounds live f32 temporaries inside the kernel.
    """
    sublane = max(8, 32 // itemsize)            # 8 f32 / 16 bf16 / 32 int8
    cap = _vmem_capacity_bytes()
    vmem_limit = min(cap // 2, 64 * 1024 * 1024)   # 32 MiB v7x, 64 MiB v5e/v6e
    budget = (vmem_limit * 3) // 4                 # headroom for temps/spill

    padded_rows = -(-n_rows // sublane) * sublane

    # In-kernel chunk (bounded so its ~4 f32 temporaries use <= half the budget).
    chunk_rows = min(max_chunk_rows, padded_rows)
    chunk_cap = budget // (2 * width * 4 * 4)
    chunk_rows = min(chunk_rows, max(sublane, (chunk_cap // sublane) * sublane))
    chunk_rows = max(sublane, (chunk_rows // sublane) * sublane)

    fixed_bytes = chunk_rows * width * 4 * 4        # ~4 f32 temp tiles
    per_row = 4 * itemsize * width                  # double-buffered in + out

    rows_budget = max(chunk_rows, (budget - fixed_bytes) // max(per_row, 1))
    rows_target = max(chunk_rows,
                      target_input_bytes // max(width * itemsize, 1))
    row_tile = min(rows_budget, rows_target)
    row_tile = max(chunk_rows, (row_tile // chunk_rows) * chunk_rows)

    # Never larger than the (sublane-rounded) rows we actually have.
    if row_tile > padded_rows:
        row_tile = max(chunk_rows, (padded_rows // chunk_rows) * chunk_rows)
    return row_tile, chunk_rows, vmem_limit


# ---------------------------------------------------------------------------
# Wrapper
# ---------------------------------------------------------------------------

def layer_norm(x, gamma, beta, eps=1e-12):
    orig_shape = x.shape
    d_model = orig_shape[-1]
    x2 = x.reshape(-1, d_model)
    n_rows = x2.shape[0]
    itemsize = jnp.dtype(x.dtype).itemsize

    # f32 affine for f32 inputs; input-dtype affine (bf16 VALU) otherwise.
    param_dtype = jnp.float32 if x.dtype == jnp.float32 else x.dtype

    # Lane-dense packing for narrow d_model.
    pack = 1
    if d_model < 128 and 128 % d_model == 0 and n_rows % (128 // d_model) == 0:
        pack = 128 // d_model
    width = d_model * pack
    rows = n_rows // pack

    tile, chunk, vmem_limit = _plan_tiles(rows, width, itemsize)
    grid = pl.cdiv(rows, tile)      # ragged last block is masked by Pallas

    if pack > 1:
        xw = x2.reshape(rows, width)
        gamma_w = jnp.tile(gamma.reshape(1, d_model).astype(param_dtype),
                           (1, pack))
        beta_w = jnp.tile(beta.reshape(1, d_model).astype(param_dtype),
                          (1, pack))
        seg = jnp.kron(jnp.eye(pack, dtype=jnp.float32),
                       jnp.ones((d_model, d_model), dtype=jnp.float32))
        kernel = functools.partial(_layernorm_packed_kernel, eps=eps,
                                   d_model=d_model, chunk=chunk)
        in_specs = [
            pl.BlockSpec((tile, width), lambda i: (i, 0)),
            pl.BlockSpec((width, width), lambda i: (0, 0)),
            pl.BlockSpec((1, width), lambda i: (0, 0)),
            pl.BlockSpec((1, width), lambda i: (0, 0)),
        ]
        args = (xw, seg, gamma_w, beta_w)
    else:
        xw = x2
        gamma_w = gamma.reshape(1, d_model).astype(param_dtype)
        beta_w = beta.reshape(1, d_model).astype(param_dtype)
        kernel = functools.partial(_layernorm_rows_kernel, eps=eps, chunk=chunk)
        in_specs = [
            pl.BlockSpec((tile, width), lambda i: (i, 0)),
            pl.BlockSpec((1, width), lambda i: (0, 0)),
            pl.BlockSpec((1, width), lambda i: (0, 0)),
        ]
        args = (xw, gamma_w, beta_w)

    out = pl.pallas_call(
        kernel,
        out_shape=jax.ShapeDtypeStruct((rows, width), x.dtype),
        grid_spec=pltpu.PrefetchScalarGridSpec(
            num_scalar_prefetch=0,
            grid=(grid,),
            in_specs=in_specs,
            out_specs=pl.BlockSpec((tile, width), lambda i: (i, 0)),
        ),
        compiler_params=pltpu.CompilerParams(
            dimension_semantics=("parallel",),
            vmem_limit_bytes=vmem_limit,
        ),
    )(*args)

    return out.reshape(orig_shape)


# ---------------------------------------------------------------------------
# Demo / correctness check
# ---------------------------------------------------------------------------

def _ref_layer_norm(x, gamma, beta, eps):
    mean = x.mean(-1, keepdims=True)
    var = ((x - mean) ** 2).mean(-1, keepdims=True)      # biased (unbiased=False)
    return gamma * (x - mean) / jnp.sqrt(var + eps) + beta


if __name__ == "__main__":
    key = jax.random.PRNGKey(0)

    # Small d_model (32) -> exercises the lane-dense packed path.
    batch, seq, d_model = 2, 8, 32
    x = jax.random.normal(key, (batch, seq, d_model), dtype=jnp.float32)
    gamma = jnp.ones((d_model,), dtype=jnp.float32)     # as in nn.Module.__init__
    beta = jnp.zeros((d_model,), dtype=jnp.float32)

    out = layer_norm(x, gamma, beta, eps=1e-12)
    jax.block_until_ready(out)
    ref = _ref_layer_norm(x, gamma, beta, 1e-12)
    assert jnp.allclose(out, ref, atol=1e-5, rtol=1e-5), "packed-path mismatch"

    # d_model = 128 -> exercises the generic row-streaming path.
    d_model2 = 128
    x2 = jax.random.normal(jax.random.PRNGKey(1), (batch, seq, d_model2),
                           dtype=jnp.float32)
    gamma2 = jnp.ones((d_model2,), dtype=jnp.float32)
    beta2 = jnp.zeros((d_model2,), dtype=jnp.float32)

    out2 = layer_norm(x2, gamma2, beta2, eps=1e-12)
    jax.block_until_ready(out2)
    ref2 = _ref_layer_norm(x2, gamma2, beta2, 1e-12)
    assert jnp.allclose(out2, ref2, atol=1e-5, rtol=1e-5), "generic-path mismatch"

    print("KERNEL_OK")
</pallas_src>

<mosaic_0001>
module attributes {stable_mosaic.version = 11 : i64} {
  func.func @_layernorm_packed_kernel(%arg0: i32, %arg1: memref<8x128xf32, #tpu.memory_space<vmem>>, %arg2: memref<128x128xf32, #tpu.memory_space<vmem>>, %arg3: memref<1x128xf32, #tpu.memory_space<vmem>>, %arg4: memref<1x128xf32, #tpu.memory_space<vmem>>, %arg5: memref<8x128xf32, #tpu.memory_space<vmem>>) attributes {dimension_semantics = [#tpu.dimension_semantics<parallel>], iteration_bounds = array<i64: 1>, scalar_prefetch = 0 : i64, scratch_operands = 0 : i64, tpu.core_type = #tpu.core_type<tc>, window_params = [{transform_indices = @transform_0, window_bounds = array<i64: 8, 128>}, {pipeline_mode = #tpu.pipeline_mode<synchronous>, transform_indices = @transform_1, window_bounds = array<i64: 128, 128>}, {pipeline_mode = #tpu.pipeline_mode<synchronous>, transform_indices = @transform_2, window_bounds = array<i64: 1, 128>}, {pipeline_mode = #tpu.pipeline_mode<synchronous>, transform_indices = @transform_3, window_bounds = array<i64: 1, 128>}, {transform_indices = @transform_4, window_bounds = array<i64: 8, 128>}]} {
    %c0 = arith.constant 0 : index
    %c0_0 = arith.constant 0 : index
    %0 = vector.load %arg2[%c0, %c0_0] : memref<128x128xf32, #tpu.memory_space<vmem>>, vector<128x128xf32>
    %c0_1 = arith.constant 0 : index
    %c0_2 = arith.constant 0 : index
    %1 = vector.load %arg3[%c0_1, %c0_2] : memref<1x128xf32, #tpu.memory_space<vmem>>, vector<1x128xf32>
    %c0_3 = arith.constant 0 : index
    %c0_4 = arith.constant 0 : index
    %2 = vector.load %arg4[%c0_3, %c0_4] : memref<1x128xf32, #tpu.memory_space<vmem>>, vector<1x128xf32>
    %c0_i32 = arith.constant 0 : i32
    %c1_i32 = arith.constant 1 : i32
    %3 = arith.muli %c0_i32, %c1_i32 : i32
    %c0_i32_5 = arith.constant 0 : i32
    %4 = arith.addi %c0_i32_5, %3 : i32
    %c8_i32 = arith.constant 8 : i32
    %5 = arith.muli %4, %c8_i32 : i32
    %6 = tpu.assume_multiple %5, 8 : i32
    %7 = arith.index_cast %6 : i32 to index
    %c0_6 = arith.constant 0 : index
    %8 = vector.load %arg1[%7, %c0_6] : memref<8x128xf32, #tpu.memory_space<vmem>>, vector<8x128xf32>
    %cst = arith.constant dense<0.000000e+00> : vector<8x128xf32>
    %9 = tpu.matmul %8, %0, %cst {dimension_numbers = #tpu.dot_dimension_numbers<[1], [0], [0], [1], [0, 0, 1, 1], [], []>} : vector<8x128xf32>, vector<128x128xf32>, vector<8x128xf32> -> vector<8x128xf32>
    %cst_7 = arith.constant 3.125000e-02 : f32
    %10 = vector.broadcast %cst_7 : f32 to vector<8x128xf32>
    %11 = arith.mulf %9, %10 : vector<8x128xf32>
    %12 = arith.subf %8, %11 : vector<8x128xf32>
    %13 = arith.mulf %12, %12 : vector<8x128xf32>
    %cst_8 = arith.constant dense<0.000000e+00> : vector<8x128xf32>
    %14 = tpu.matmul %13, %0, %cst_8 {dimension_numbers = #tpu.dot_dimension_numbers<[1], [0], [0], [1], [0, 0, 1, 1], [], []>} : vector<8x128xf32>, vector<128x128xf32>, vector<8x128xf32> -> vector<8x128xf32>
    %cst_9 = arith.constant 3.125000e-02 : f32
    %15 = vector.broadcast %cst_9 : f32 to vector<8x128xf32>
    %16 = arith.mulf %14, %15 : vector<8x128xf32>
    %cst_10 = arith.constant 9.99999996E-13 : f32
    %17 = vector.broadcast %cst_10 : f32 to vector<8x128xf32>
    %18 = arith.addf %16, %17 : vector<8x128xf32>
    %19 = math.rsqrt %18 : vector<8x128xf32>
    %20 = arith.mulf %12, %19 : vector<8x128xf32>
    %21 = vector.broadcast %1 : vector<1x128xf32> to vector<8x128xf32>
    %22 = arith.mulf %20, %21 : vector<8x128xf32>
    %23 = vector.broadcast %2 : vector<1x128xf32> to vector<8x128xf32>
    %24 = arith.addf %22, %23 : vector<8x128xf32>
    %25 = arith.index_cast %6 : i32 to index
    %c0_11 = arith.constant 0 : index
    %26 = vector.load %arg5[%25, %c0_11] : memref<8x128xf32, #tpu.memory_space<vmem>>, vector<8x128xf32>
    tpu.vector_store %arg5[%25, %c0_11], %24 {strides = array<i32>} : memref<8x128xf32, #tpu.memory_space<vmem>>, vector<8x128xf32>,
    %c1_i32_12 = arith.constant 1 : i32
    return
  }
  func.func @transform_0(%arg0: i32) -> (i32, i32) {
    %c0_i32 = arith.constant 0 : i32
    %c0_i32_0 = arith.constant 0 : i32
    return %arg0, %c0_i32 : i32, i32
  }
  func.func @transform_1(%arg0: i32) -> (i32, i32) {
    %c0_i32 = arith.constant 0 : i32
    %c0_i32_0 = arith.constant 0 : i32
    %c0_i32_1 = arith.constant 0 : i32
    return %c0_i32, %c0_i32_0 : i32, i32
  }
  func.func @transform_2(%arg0: i32) -> (i32, i32) {
    %c0_i32 = arith.constant 0 : i32
    %c0_i32_0 = arith.constant 0 : i32
    %c0_i32_1 = arith.constant 0 : i32
    return %c0_i32, %c0_i32_0 : i32, i32
  }
  func.func @transform_3(%arg0: i32) -> (i32, i32) {
    %c0_i32 = arith.constant 0 : i32
    %c0_i32_0 = arith.constant 0 : i32
    %c0_i32_1 = arith.constant 0 : i32
    return %c0_i32, %c0_i32_0 : i32, i32
  }
  func.func @transform_4(%arg0: i32) -> (i32, i32) {
    %c0_i32 = arith.constant 0 : i32
    %c0_i32_0 = arith.constant 0 : i32
    return %arg0, %c0_i32 : i32, i32
  }
}

</mosaic_0001>

<bundles_post_ra>
// kernel: tpu_custom_call.1
= control target key start
LH: loop header
LB: loop body
LE: loop exit
PB: predicated region body
PF: predicated region fallthrough
CT: control target
= control target key end

     0   :  { %9 = vsyncpa [#allocation3], 0  ;;  %s566_s0 = inlined_call_operand.hbm [shape: f32[4,128], index: 0, kind: input, shape index: {}]   ;;  %s567_s1 = inlined_call_operand.hbm [shape: f32[128,128], index: 1, kind: input, shape index: {}]   ;;  %s568_s2 = inlined_call_operand.vmem [shape: f32[1,128], index: 2, kind: input, shape index: {}]   ;;  %s569_s3 = inlined_call_operand.vmem [shape: f32[1,128], index: 3, kind: input, shape index: {}]   ;;  %s570_s4 = inlined_call_operand.hbm [shape: f32[4,128], index: 4, kind: output, shape index: {}]  }
   0x1   :  { %10 = vsyncpa [#allocation6], 0 }
   0x2   :  { %11 = vsyncpa [#allocation4], 0 }
   0x3   :  { %16 = vsyncadd [#allocation3], 64  ;;  %s483_s15 = smov [#allocation2]   ;;  %s411_s19 = scalar_lea.hbm %s566_s0, 64 }
   0x4   :  { %s17_s16 = sshll.u32 %s483_s15, 4  ;;  %p412_p0 = scmp.ne.s32.totalorder %s566_s0, %s411_s19  ;;  %s18_s16 = int_to_ptr.vmem [resolvable:$true] %s17_s16 }
   0x5   :  { %p415_p1 = scmp.lt.u32.totalorder %s411_s19, %s566_s0 }
   0x7   :  { %p417_p2 = pnand %p415_p1, %p412_p0 }
   0x9   :  { %420 = shalt.err (!%p417_p2)
}
   0xa   :  { %s421_s24 = scalar_lea.vmem %s18_s16, 64  ;;  %s425_s25 = scalar_lea.vmem %s18_s16, 128 }
   0xb   :  { %p422_p3 = scmp.ne.s32.totalorder %s18_s16, %s421_s24  ;;  %p426_p4 = scmp.lt.s32.totalorder %s18_s16, %s18_s16 }
   0xc   :  { %p427_p5 = scmp.lt.s32.totalorder %s425_s25, %s421_s24 }
   0xe   :  { %p428_p6 = por %p427_p5, %p426_p4 }
  0x10   :  { %p429_p7 = pnand %p428_p6, %p422_p3 }
  0x12   :  { %432 = shalt.err (!%p429_p7)
}
  0x13   :  { %s484_s26 = smov 64   ;;  %s485_s27 = smov 4  }
  0x14   :  { %23 = dma.hbm_to_vmem [thread:$0]  %s566_s0, 64, %s18_s16, [#allocation3], %s484_s26, %s484_s26, %s485_s27  }
  0x15   :  { %s486_s30 = smov [#allocation5]   ;;  %s433_s8 = scalar_lea.hbm %s567_s1, 2048 }
  0x16   :  { %s29_s5 = sshll.u32 %s486_s30, 4  ;;  %p434_p8 = scmp.ne.s32.totalorder %s567_s1, %s433_s8  ;;  %s30_s5 = int_to_ptr.vmem [resolvable:$true] %s29_s5 }
  0x17   :  { %p437_p9 = scmp.lt.u32.totalorder %s433_s8, %s567_s1 }
  0x19   :  { %p439_p10 = pnand %p437_p9, %p434_p8 }
  0x1b   :  { %442 = shalt.err (!%p439_p10)
}
  0x1c   :  { %s443_s13 = scalar_lea.vmem %s30_s5, 2048  ;;  %p448_p12 = scmp.lt.s32.totalorder %s30_s5, %s30_s5 }
  0x1d   :  { %p444_p11 = scmp.ne.s32.totalorder %s30_s5, %s443_s13  ;;  %p449_p13 = scmp.lt.s32.totalorder %s443_s13, %s443_s13 }
  0x1f   :  { %p450_p0 = por %p449_p13, %p448_p12 }
  0x21   :  { %p451_p1 = pnand %p450_p0, %p444_p11 }
  0x23   :  { %454 = shalt.err (!%p451_p1)
}
  0x24   :  { %s487_s0 = smov 128   ;;  %s488_s14 = smov 8  }
  0x25   :  { %35 = dma.hbm_to_vmem [thread:$0]  %s567_s1, 2048, %s30_s5, [#allocation6], %s487_s0, %s487_s0, %s488_s14  }
  0x26   :  { %477 = dma.done.wait [#allocation3], 128  }
  0x27   :  { %478 = vsyncadd [#allocation3], 4294967168 }
  0x28   :  { %479 = dma.done.wait [#allocation6], 2048  }
  0x29   :  { %480 = vsyncadd [#allocation6], 4294965248  ;;  %v489_v0 = vmov 0.0|0.0   ;;  %vm490_vm0 = vmmov 0   ;;  %v491_v1 = vmov 0.0   ;;  %v46_v2 = vld [vmem:[#allocation5] sm:$0xff] }
  0x2a   :  { %351 = vmatprep.subr.bf16.mxu0 %v489_v0  ;;  %313 = vmatprep.mubr.msk.f32.mxu0 %vm490_vm0, %v491_v1  ;;  %v47_v3 = vld [vmem:[#allocation5 + $0x8] sm:$0xff]  ;;  %v48_v4 = vld [vmem:[#allocation5 + $0x10] sm:$0xff]  ;;  %v49_v6 = vld [vmem:[#allocation5 + $0x18] sm:$0xff] }
  0x2b   :  { %375 = vmatprep.subr.bf16.mxu1 %v489_v0  ;;  %348 = vmatprep.mubr.msk.f32.mxu1 %vm490_vm0, %v491_v1  ;;  %v352_v5 = vpack.c.bf16 %v47_v3, %v46_v2  ;;  %v355_v7 = vpack.c.bf16 %v49_v6, %v48_v4  ;;  %v50_v8 = vld [vmem:[#allocation5 + $0x20] sm:$0xff]  ;;  %v51_v9 = vld [vmem:[#allocation5 + $0x28] sm:$0xff]  ;;  %v52_v11 = vld [vmem:[#allocation5 + $0x30] sm:$0xff] }
  0x2c   :  { %v358_v10 = vpack.c.bf16 %v51_v9, %v50_v8  ;;  %v53_v12 = vld [vmem:[#allocation5 + $0x38] sm:$0xff]  ;;  %v54_v14 = vld [vmem:[#allocation5 + $0x40] sm:$0xff]  ;;  %v55_v15 = vld [vmem:[#allocation5 + $0x48] sm:$0xff] }
  0x2d   :  { %353 = vmatpush3.bf16.msra.mxu0 %v352_v5  ;;  %377 = vmatpush3.bf16.msra.mxu1 %v352_v5  ;;  %v361_v13 = vpack.c.bf16 %v53_v12, %v52_v11  ;;  %v364_v16 = vpack.c.bf16 %v55_v15, %v54_v14  ;;  %v56_v17 = vld [vmem:[#allocation5 + $0x50] sm:$0xff]  ;;  %v57_v18 = vld [vmem:[#allocation5 + $0x58] sm:$0xff]  ;;  %v58_v20 = vld [vmem:[#allocation5 + $0x60] sm:$0xff] }
  0x2e   :  { %354 = vmatprep.subr.bf16.mxu0 %v489_v0  ;;  %378 = vmatprep.subr.bf16.mxu1 %v489_v0  ;;  %v367_v19 = vpack.c.bf16 %v57_v18, %v56_v17  ;;  %v59_v21 = vld [vmem:[#allocation5 + $0x68] sm:$0xff]  ;;  %v60_v23 = vld [vmem:[#allocation5 + $0x70] sm:$0xff]  ;;  %v61_v24 = vld [vmem:[#allocation5 + $0x78] sm:$0xff] }
  0x2f   :  { %v370_v22 = vpack.c.bf16 %v59_v21, %v58_v20  ;;  %v373_v25 = vpack.c.bf16 %v61_v24, %v60_v23  ;;  %v64_v26 = vld [vmem:[#allocation2] sm:$0xff] }
  0x30   :  { %v245_v37 = vld [vmem:[%s568_s2] ss:$0 sm:$0xff] }
  0x31   :  { %356 = vmatpush3.bf16.msra.mxu0 %v355_v7  ;;  %380 = vmatpush3.bf16.msra.mxu1 %v355_v7  ;;  %v246_v39 = vld [vmem:[%s569_s3] ss:$0 sm:$0xff] }
  0x32   :  { %357 = vmatprep.subr.bf16.mxu0 %v489_v0  ;;  %381 = vmatprep.subr.bf16.mxu1 %v489_v0 }
  0x35   :  { %359 = vmatpush3.bf16.msra.mxu0 %v358_v10  ;;  %383 = vmatpush3.bf16.msra.mxu1 %v358_v10 }
  0x36   :  { %360 = vmatprep.subr.bf16.mxu0 %v489_v0  ;;  %384 = vmatprep.subr.bf16.mxu1 %v489_v0 }
  0x39   :  { %362 = vmatpush3.bf16.msra.mxu0 %v361_v13  ;;  %386 = vmatpush3.bf16.msra.mxu1 %v361_v13 }
  0x3a   :  { %363 = vmatprep.subr.bf16.mxu0 %v489_v0  ;;  %387 = vmatprep.subr.bf16.mxu1 %v489_v0 }
  0x3d   :  { %365 = vmatpush3.bf16.msra.mxu0 %v364_v16  ;;  %389 = vmatpush3.bf16.msra.mxu1 %v364_v16 }
  0x3e   :  { %366 = vmatprep.subr.bf16.mxu0 %v489_v0  ;;  %390 = vmatprep.subr.bf16.mxu1 %v489_v0 }
  0x41   :  { %368 = vmatpush3.bf16.msra.mxu0 %v367_v19  ;;  %392 = vmatpush3.bf16.msra.mxu1 %v367_v19 }
  0x42   :  { %369 = vmatprep.subr.bf16.mxu0 %v489_v0  ;;  %393 = vmatprep.subr.bf16.mxu1 %v489_v0 }
  0x45   :  { %371 = vmatpush3.bf16.msra.mxu0 %v370_v22  ;;  %395 = vmatpush3.bf16.msra.mxu1 %v370_v22 }
  0x46   :  { %372 = vmatprep.subr.bf16.mxu0 %v489_v0  ;;  %396 = vmatprep.subr.bf16.mxu1 %v489_v0 }
  0x49   :  { %374 = vmatpush3.bf16.msra.mxu0 %v373_v25  ;;  %398 = vmatpush3.bf16.msra.mxu1 %v373_v25 }
  0x4c   :  { %314 = vmatmul.mubr.f32.vlgmr.msra.gmra.mrb[0].mxu0 %v64_v26 }
 0x11f   :  { %v131_v27 = vpop.f32.mrb[0].mxu0 }
 0x120   :  { %v135_v28 = vmul.f32 0.03125, %v131_v27  ;;  %v315_v29 = vpop.f32.mrb[1].mxu0 }
 0x122   :  { %v136_v30 = vsub.f32 %v64_v26, %v135_v28 }
 0x124   :  { %v137_v31 = vmul.f32 %v136_v30, %v136_v30 }
 0x126   :  { %349 = vmatmul.mubr.f32.vlgmr.msra.gmra.mrb[0].mxu1 %v137_v31 }
 0x1f9   :  { %v204_v32 = vpop.f32.mrb[0].mxu1 }
 0x1fa   :  { %v208_v33 = vmul.f32 0.03125, %v204_v32  ;;  %v350_v34 = vpop.f32.mrb[1].mxu1 }
 0x1fc   :  { %v209_v35 = vadd.f32 1e-12, %v208_v33 }
 0x1fe   :  { %409 = vrsqrt.f32 %v209_v35 }
 0x208   :  { %v410_v36 = vpop.eup %409 }
 0x209   :  { %v211_v38 = vmul.f32 %v410_v36, %v136_v30 }
 0x20b   :  { %v218_v40 = vmul.f32 %v245_v37, %v211_v38 }
 0x20d   :  { %v225_v41 = vadd.f32 %v246_v39, %v218_v40 }
 0x20f   :  { %226 = vst [vmem:[#allocation7] sm:$0xff] %v225_v41 }
 0x210   :  { %231 = vsyncadd [#allocation4], 64  ;;  %s492_s20 = smov [#allocation7]  }
 0x211   :  { %s232_s21 = sshll.u32 %s492_s20, 4  ;;  %s233_s21 = int_to_ptr.vmem [resolvable:$true] %s232_s21 }
 0x212   :  { %s455_s22 = scalar_lea.vmem %s233_s21, 64  ;;  %s459_s23 = scalar_lea.vmem %s233_s21, 128 }
 0x213   :  { %p456_p2 = scmp.ne.s32.totalorder %s233_s21, %s455_s22  ;;  %p460_p3 = scmp.lt.s32.totalorder %s233_s21, %s233_s21 }
 0x214   :  { %p461_p4 = scmp.lt.s32.totalorder %s459_s23, %s455_s22 }
 0x216   :  { %p462_p5 = por %p461_p4, %p460_p3 }
 0x218   :  { %p463_p6 = pnand %p462_p5, %p456_p2 }
 0x21a   :  { %466 = shalt.err (!%p463_p6)
}
 0x21b   :  { %s467_s25 = scalar_lea.hbm %s570_s4, 64 }
 0x21c   :  { %p468_p7 = scmp.ne.s32.totalorder %s570_s4, %s467_s25  ;;  %p471_p8 = scmp.lt.u32.totalorder %s467_s25, %s570_s4 }
 0x21e   :  { %p473_p9 = pnand %p471_p8, %p468_p7 }
 0x220   :  { %476 = shalt.err (!%p473_p9)
}
 0x221   :  { %238 = dma.vmem_to_hbm [thread:$0]  %s233_s21, 64, %s570_s4, [#allocation4], %s484_s26, %s484_s26, %s485_s27  }
 0x222   :  { %481 = dma.done.wait [#allocation4], 128  }
 0x223   :  { %482 = vsyncadd [#allocation4], 4294967168 }
 0x224   :  { %242 = vsyncpa [#allocation3], 1 }
 0x225   :  { %243 = vsyncpa [#allocation6], 1 }
 0x226   :  { %244 = vsyncpa [#allocation4], 1 }

</bundles_post_ra>
